<compile_context>
chip_gen: v6e
topology: v6e:2x2x1
jax: 0.10.0
libtpu: 0.0.40
codegen_flags: <defaults>
</compile_context>

<pallas_src>
import functools
import math

import jax
import jax.numpy as jnp
from jax import lax
from jax.experimental import pallas as pl
from jax.experimental.pallas import tpu as pltpu


def data_embedding_kernel(x_ref, wh_ref, wl_ref, pos_ref, o_ref, colh_ref, coll_ref):
    # x_ref   : (1, A, S, c_in) f32   full spatial slab of one batch element
    #                                 (constant index over the row-tile axis -> resident)
    # wh/wl   : (9*c_in, d_model) bf16  hi/lo-split conv weight, resident
    # pos_ref : (S, d_model) f32        positional table, resident
    # o_ref   : (1, TA, S, d_model)     output row-tile (rows a in [t*TA, (t+1)*TA))
    # colh/l  : (A*S, 9*c_in) bf16      per-batch im2col LHS (hi / lo), VMEM scratch
    t = pl.program_id(1)
    _, A, S, c_in = x_ref.shape
    TA = o_ref.shape[1]
    d_model = o_ref.shape[3]
    M = A * S
    mt = TA * S

    # ---- once per batch element: build the circular-conv im2col LHS in VMEM ----
    @pl.when(t == 0)
    def _build_im2col():
        xb = x_ref[0]                                    # (A, S, c_in) f32
        xh = xb.astype(jnp.bfloat16)                     # hi/lo split: once, not per tap
        xl = (xb - xh.astype(jnp.float32)).astype(jnp.bfloat16)
        for src, dst in ((xh, colh_ref), (xl, coll_ref)):
            # circular halo of 1 along A and S, built as a VMEM value (no HBM pad)
            xp = jnp.concatenate([src[-1:], src, src[:1]], axis=0)       # (A+2, S,   c)
            xp = jnp.concatenate([xp[:, -1:], xp, xp[:, :1]], axis=1)    # (A+2, S+2, c)
            for kh in range(3):
                for kw in range(3):
                    tap = kh * 3 + kw
                    # im2col row (a*S + s), tap cols <- x[(a+kw-1)%A, (s+kh-1)%S, :]
                    dst[:, tap * c_in:(tap + 1) * c_in] = (
                        xp[kw:kw + A, kh:kh + S, :].reshape(M, c_in))

    # ---- per row-tile: one merged-K matmul (bf16x3) + positional broadcast-add ----
    row0 = t * mt
    if mt % 8 == 0:
        row0 = pl.multiple_of(row0, 8)
    lhs_h = colh_ref[pl.ds(row0, mt), :]                 # (mt, 9*c_in) bf16
    lhs_l = coll_ref[pl.ds(row0, mt), :]
    wh = wh_ref[...]
    wl = wl_ref[...]
    # bf16x3: (h+l)@(wh+wl) with the lo*lo term dropped, f32 accumulation
    acc = jnp.dot(lhs_h, wh, preferred_element_type=jnp.float32)
    acc = acc + jnp.dot(lhs_h, wl, preferred_element_type=jnp.float32)
    acc = acc + jnp.dot(lhs_l, wh, preferred_element_type=jnp.float32)

    out = acc.reshape(TA, S, d_model) + pos_ref[...]     # pos broadcast over the A tile
    o_ref[0] = out.astype(o_ref.dtype)


def make_positional_embedding(seq_len, d_model):
    position = jnp.arange(seq_len, dtype=jnp.float32)[:, None]
    div_term = jnp.exp(jnp.arange(0, d_model, 2, dtype=jnp.float32)
                       * (-math.log(10000.0) / d_model))
    pe = jnp.zeros((seq_len, d_model), jnp.float32)
    pe = pe.at[:, 0::2].set(jnp.sin(position * div_term))
    pe = pe.at[:, 1::2].set(jnp.cos(position * div_term))
    return pe


def prepare_params(weight_oihw, seq_len):
    """Precompute (once, outside the per-call path) the kernel-side constants."""
    d_model, c_in = weight_oihw.shape[0], weight_oihw.shape[1]
    # OIHW -> (kh, kw, c_in, d_model) -> (9*c_in, d_model); row = (kh*3 + kw)*c_in + i
    w = jnp.transpose(weight_oihw, (2, 3, 1, 0)).reshape(9 * c_in, d_model)
    w = w.astype(jnp.float32)
    w_hi = w.astype(jnp.bfloat16)                                  # hi/lo split hoisted
    w_lo = (w - w_hi.astype(jnp.float32)).astype(jnp.bfloat16)     # out of the kernel
    pos = make_positional_embedding(seq_len, d_model)              # (S, d_model) f32
    return w_hi, w_lo, pos


def _pick_row_tile(A, S, d_model):
    """Rows of A per grid step: enough rows (TA*S) to amortize the ~0.35us step overhead
    and fill the MXU, few enough that the f32 accumulator (~rows*d_model*4B) stays small."""
    target_rows = max(64, min(1024, (128 * 1024) // max(4 * d_model, 1)))
    ta = max(1, min(A, target_rows // max(S, 1)))
    while A % ta:           # exact divisor of A keeps the index maps trivial
        ta -= 1
    return ta


def _vmem_limit_bytes(A, S, c_in, d_model, ta):
    f32, bf16 = 4, 2
    blocks = (A * S * c_in * f32                    # resident x slab
              + 2 * 9 * c_in * d_model * bf16       # hi/lo weights
              + S * d_model * f32                   # positional table
              + ta * S * d_model * f32)             # output tile
    scratch = 2 * A * S * 9 * c_in * bf16           # im2col hi/lo
    est = 2 * blocks + scratch                      # x2: double-buffered pipeline copies
    est = 3 * est + (1 << 20)                       # headroom: relayout temps + acc
    return int(min(max(est, 16 * 1024 * 1024), 48 * 1024 * 1024))


@functools.partial(jax.jit, static_argnames=("ta",))
def data_embedding(x, w_hi, w_lo, pos, ta=None):
    """x: (B, A, S, c_in) -- same layout as the PyTorch module input.
       w_hi/w_lo: (9*c_in, d_model) bf16, pos: (S, d_model) f32, from prepare_params().
       Returns (B, A, S, d_model)."""
    B, A, S, c_in = x.shape
    d_model = w_hi.shape[-1]
    if ta is None:
        ta = _pick_row_tile(A, S, d_model)
    assert A % ta == 0, (A, ta)
    nta = A // ta

    # TODO(synk): nn.Dropout(p=0.1) is identity at inference; training-mode dropout
    # (pltpu.prng_seed + pltpu.prng_random_bits masking) not implemented.
    return pl.pallas_call(
        data_embedding_kernel,
        out_shape=jax.ShapeDtypeStruct((B, A, S, d_model), x.dtype),
        grid=(B, nta),
        in_specs=[
            # full spatial slab per batch element; constant over t -> DMA'd once per b
            pl.BlockSpec((1, A, S, c_in), lambda b, t: (b, 0, 0, 0)),
            # constant block indices -> fetched once, kept resident in VMEM
            pl.BlockSpec((9 * c_in, d_model), lambda b, t: (0, 0)),
            pl.BlockSpec((9 * c_in, d_model), lambda b, t: (0, 0)),
            pl.BlockSpec((S, d_model), lambda b, t: (0, 0)),
        ],
        out_specs=pl.BlockSpec((1, ta, S, d_model), lambda b, t: (b, t, 0, 0)),
        scratch_shapes=[
            pltpu.VMEM((A * S, 9 * c_in), jnp.bfloat16),   # im2col hi
            pltpu.VMEM((A * S, 9 * c_in), jnp.bfloat16),   # im2col lo
        ],
        compiler_params=pltpu.CompilerParams(
            dimension_semantics=("parallel", "arbitrary"),
            vmem_limit_bytes=_vmem_limit_bytes(A, S, c_in, d_model, ta),
        ),
    )(x, w_hi, w_lo, pos)


def reference(x, weight_oihw):
    # pure-JAX f32 reference: NCHW Conv2d with circular padding, exactly as TokenEmbedding.
    x_nchw = jnp.transpose(x, (0, 3, 2, 1))                        # (B, c_in, S, A)
    x_pad = jnp.pad(x_nchw, ((0, 0), (0, 0), (1, 1), (1, 1)), mode="wrap")
    y = lax.conv_general_dilated(x_pad, weight_oihw, window_strides=(1, 1),
                                 padding="VALID",
                                 dimension_numbers=("NCHW", "OIHW", "NCHW"),
                                 precision=lax.Precision.HIGHEST)
    y = jnp.transpose(y, (0, 3, 2, 1))                             # (B, A, S, d_model)
    S, d_model = y.shape[2], y.shape[3]
    pos = make_positional_embedding(S, d_model)
    return y + pos[None, None]                                     # broadcast over B, A


if __name__ == "__main__":
    B, A, S, c_in, d_model = 2, 4, 8, 4, 32
    key = jax.random.PRNGKey(0)
    kx, kw = jax.random.split(key)
    x = jax.random.normal(kx, (B, A, S, c_in), dtype=jnp.float32)
    # deterministic synthetic Conv2d weight (OIHW); bias=False in the module
    weight = jax.random.normal(kw, (d_model, c_in, 3, 3), dtype=jnp.float32) * 0.1

    w_hi, w_lo, pos = prepare_params(weight, S)        # hoisted out of the call path
    # ta=2 -> two row-tiles per batch element: exercises the M-tiling grid axis
    out = jax.block_until_ready(data_embedding(x, w_hi, w_lo, pos, ta=2))
    ref = reference(x, weight)

    assert out.shape == (B, A, S, d_model)
    max_err = float(jnp.max(jnp.abs(out - ref)))
    assert jnp.allclose(out, ref, atol=1e-3, rtol=1e-3), max_err
    print("KERNEL_OK")
</pallas_src>

<mosaic_0001>
module attributes {stable_mosaic.version = 11 : i64} {
  func.func @data_embedding_kernel(%arg0: i32, %arg1: i32, %arg2: memref<1x4x8x4xf32, #tpu.memory_space<vmem>>, %arg3: memref<36x32xbf16, #tpu.memory_space<vmem>>, %arg4: memref<36x32xbf16, #tpu.memory_space<vmem>>, %arg5: memref<8x32xf32, #tpu.memory_space<vmem>>, %arg6: memref<1x2x8x32xf32, #tpu.memory_space<vmem>>, %arg7: memref<32x36xbf16, #tpu.memory_space<vmem>>, %arg8: memref<32x36xbf16, #tpu.memory_space<vmem>>) attributes {dimension_semantics = [#tpu.dimension_semantics<parallel>, #tpu.dimension_semantics<arbitrary>], iteration_bounds = array<i64: 2, 2>, scalar_prefetch = 0 : i64, scratch_operands = 2 : i64, tpu.core_type = #tpu.core_type<tc>, window_params = [{transform_indices = @transform_0, window_bounds = array<i64: 1, 4, 8, 4>}, {pipeline_mode = #tpu.pipeline_mode<synchronous>, transform_indices = @transform_1, window_bounds = array<i64: 36, 32>}, {pipeline_mode = #tpu.pipeline_mode<synchronous>, transform_indices = @transform_2, window_bounds = array<i64: 36, 32>}, {pipeline_mode = #tpu.pipeline_mode<synchronous>, transform_indices = @transform_3, window_bounds = array<i64: 8, 32>}, {transform_indices = @transform_4, window_bounds = array<i64: 1, 2, 8, 32>}]} {
    %c0_i32 = arith.constant 0 : i32
    %0 = arith.cmpi eq, %arg1, %c0_i32 : i32
    %1 = arith.extui %0 : i1 to i32
    %c0_i32_0 = arith.constant 0 : i32
    %2 = arith.cmpi ne, %1, %c0_i32_0 : i32
    scf.if %2 {
      %c0_14 = arith.constant 0 : index
      %c0_15 = arith.constant 0 : index
      %c0_16 = arith.constant 0 : index
      %c0_17 = arith.constant 0 : index
      %24 = vector.load %arg2[%c0_14, %c0_15, %c0_16, %c0_17] : memref<1x4x8x4xf32, #tpu.memory_space<vmem>>, vector<1x4x8x4xf32>
      %25 = vector.shape_cast %24 : vector<1x4x8x4xf32> to vector<4x8x4xf32>
      %26 = arith.truncf %25 : vector<4x8x4xf32> to vector<4x8x4xbf16>
      %27 = arith.extf %26 : vector<4x8x4xbf16> to vector<4x8x4xf32>
      %28 = arith.subf %25, %27 : vector<4x8x4xf32>
      %29 = arith.truncf %28 : vector<4x8x4xf32> to vector<4x8x4xbf16>
      %30 = vector.extract_strided_slice %26 {offsets = [3, 0, 0], sizes = [1, 8, 4], strides = [1, 1, 1]} : vector<4x8x4xbf16> to vector<1x8x4xbf16>
      %31 = vector.extract_strided_slice %26 {offsets = [0, 0, 0], sizes = [1, 8, 4], strides = [1, 1, 1]} : vector<4x8x4xbf16> to vector<1x8x4xbf16>
      %32 = tpu.concatenate %30, %26, %31 in 0 : vector<1x8x4xbf16>, vector<4x8x4xbf16>, vector<1x8x4xbf16> -> vector<6x8x4xbf16>
      %33 = vector.extract_strided_slice %32 {offsets = [0, 7, 0], sizes = [6, 1, 4], strides = [1, 1, 1]} : vector<6x8x4xbf16> to vector<6x1x4xbf16>
      %34 = vector.extract_strided_slice %32 {offsets = [0, 0, 0], sizes = [6, 1, 4], strides = [1, 1, 1]} : vector<6x8x4xbf16> to vector<6x1x4xbf16>
      %35 = tpu.concatenate %33, %32, %34 in 1 : vector<6x1x4xbf16>, vector<6x8x4xbf16>, vector<6x1x4xbf16> -> vector<6x10x4xbf16>
      %36 = vector.extract_strided_slice %35 {offsets = [0, 0, 0], sizes = [4, 8, 4], strides = [1, 1, 1]} : vector<6x10x4xbf16> to vector<4x8x4xbf16>
      %37 = vector.shape_cast %36 : vector<4x8x4xbf16> to vector<32x4xbf16>
      %c0_18 = arith.constant 0 : index
      %c0_19 = arith.constant 0 : index
      %38 = vector.load %arg7[%c0_18, %c0_19] : memref<32x36xbf16, #tpu.memory_space<vmem>>, vector<32x4xbf16>
      tpu.vector_store %arg7[%c0_18, %c0_19], %37 {strides = array<i32>} : memref<32x36xbf16, #tpu.memory_space<vmem>>, vector<32x4xbf16>,
      %39 = vector.extract_strided_slice %35 {offsets = [1, 0, 0], sizes = [4, 8, 4], strides = [1, 1, 1]} : vector<6x10x4xbf16> to vector<4x8x4xbf16>
      %40 = vector.shape_cast %39 : vector<4x8x4xbf16> to vector<32x4xbf16>
      %c0_20 = arith.constant 0 : index
      %c4 = arith.constant 4 : index
      %41 = vector.load %arg7[%c0_20, %c4] : memref<32x36xbf16, #tpu.memory_space<vmem>>, vector<32x4xbf16>
      tpu.vector_store %arg7[%c0_20, %c4], %40 {strides = array<i32>} : memref<32x36xbf16, #tpu.memory_space<vmem>>, vector<32x4xbf16>,
      %42 = vector.extract_strided_slice %35 {offsets = [2, 0, 0], sizes = [4, 8, 4], strides = [1, 1, 1]} : vector<6x10x4xbf16> to vector<4x8x4xbf16>
      %43 = vector.shape_cast %42 : vector<4x8x4xbf16> to vector<32x4xbf16>
      %c0_21 = arith.constant 0 : index
      %c8 = arith.constant 8 : index
      %44 = vector.load %arg7[%c0_21, %c8] : memref<32x36xbf16, #tpu.memory_space<vmem>>, vector<32x4xbf16>
      tpu.vector_store %arg7[%c0_21, %c8], %43 {strides = array<i32>} : memref<32x36xbf16, #tpu.memory_space<vmem>>, vector<32x4xbf16>,
      %45 = vector.extract_strided_slice %35 {offsets = [0, 1, 0], sizes = [4, 8, 4], strides = [1, 1, 1]} : vector<6x10x4xbf16> to vector<4x8x4xbf16>
      %46 = vector.shape_cast %45 : vector<4x8x4xbf16> to vector<32x4xbf16>
      %c0_22 = arith.constant 0 : index
      %c12 = arith.constant 12 : index
      %47 = vector.load %arg7[%c0_22, %c12] : memref<32x36xbf16, #tpu.memory_space<vmem>>, vector<32x4xbf16>
      tpu.vector_store %arg7[%c0_22, %c12], %46 {strides = array<i32>} : memref<32x36xbf16, #tpu.memory_space<vmem>>, vector<32x4xbf16>,
      %48 = vector.extract_strided_slice %35 {offsets = [1, 1, 0], sizes = [4, 8, 4], strides = [1, 1, 1]} : vector<6x10x4xbf16> to vector<4x8x4xbf16>
      %49 = vector.shape_cast %48 : vector<4x8x4xbf16> to vector<32x4xbf16>
      %c0_23 = arith.constant 0 : index
      %c16 = arith.constant 16 : index
      %50 = vector.load %arg7[%c0_23, %c16] : memref<32x36xbf16, #tpu.memory_space<vmem>>, vector<32x4xbf16>
      tpu.vector_store %arg7[%c0_23, %c16], %49 {strides = array<i32>} : memref<32x36xbf16, #tpu.memory_space<vmem>>, vector<32x4xbf16>,
      %51 = vector.extract_strided_slice %35 {offsets = [2, 1, 0], sizes = [4, 8, 4], strides = [1, 1, 1]} : vector<6x10x4xbf16> to vector<4x8x4xbf16>
      %52 = vector.shape_cast %51 : vector<4x8x4xbf16> to vector<32x4xbf16>
      %c0_24 = arith.constant 0 : index
      %c20 = arith.constant 20 : index
      %53 = vector.load %arg7[%c0_24, %c20] : memref<32x36xbf16, #tpu.memory_space<vmem>>, vector<32x4xbf16>
      tpu.vector_store %arg7[%c0_24, %c20], %52 {strides = array<i32>} : memref<32x36xbf16, #tpu.memory_space<vmem>>, vector<32x4xbf16>,
      %54 = vector.extract_strided_slice %35 {offsets = [0, 2, 0], sizes = [4, 8, 4], strides = [1, 1, 1]} : vector<6x10x4xbf16> to vector<4x8x4xbf16>
      %55 = vector.shape_cast %54 : vector<4x8x4xbf16> to vector<32x4xbf16>
      %c0_25 = arith.constant 0 : index
      %c24 = arith.constant 24 : index
      %56 = vector.load %arg7[%c0_25, %c24] : memref<32x36xbf16, #tpu.memory_space<vmem>>, vector<32x4xbf16>
      tpu.vector_store %arg7[%c0_25, %c24], %55 {strides = array<i32>} : memref<32x36xbf16, #tpu.memory_space<vmem>>, vector<32x4xbf16>,
      %57 = vector.extract_strided_slice %35 {offsets = [1, 2, 0], sizes = [4, 8, 4], strides = [1, 1, 1]} : vector<6x10x4xbf16> to vector<4x8x4xbf16>
      %58 = vector.shape_cast %57 : vector<4x8x4xbf16> to vector<32x4xbf16>
      %c0_26 = arith.constant 0 : index
      %c28 = arith.constant 28 : index
      %59 = vector.load %arg7[%c0_26, %c28] : memref<32x36xbf16, #tpu.memory_space<vmem>>, vector<32x4xbf16>
      tpu.vector_store %arg7[%c0_26, %c28], %58 {strides = array<i32>} : memref<32x36xbf16, #tpu.memory_space<vmem>>, vector<32x4xbf16>,
      %60 = vector.extract_strided_slice %35 {offsets = [2, 2, 0], sizes = [4, 8, 4], strides = [1, 1, 1]} : vector<6x10x4xbf16> to vector<4x8x4xbf16>
      %61 = vector.shape_cast %60 : vector<4x8x4xbf16> to vector<32x4xbf16>
      %c0_27 = arith.constant 0 : index
      %c32 = arith.constant 32 : index
      %62 = vector.load %arg7[%c0_27, %c32] : memref<32x36xbf16, #tpu.memory_space<vmem>>, vector<32x4xbf16>
      tpu.vector_store %arg7[%c0_27, %c32], %61 {strides = array<i32>} : memref<32x36xbf16, #tpu.memory_space<vmem>>, vector<32x4xbf16>,
      %63 = vector.extract_strided_slice %29 {offsets = [3, 0, 0], sizes = [1, 8, 4], strides = [1, 1, 1]} : vector<4x8x4xbf16> to vector<1x8x4xbf16>
      %64 = vector.extract_strided_slice %29 {offsets = [0, 0, 0], sizes = [1, 8, 4], strides = [1, 1, 1]} : vector<4x8x4xbf16> to vector<1x8x4xbf16>
      %65 = tpu.concatenate %63, %29, %64 in 0 : vector<1x8x4xbf16>, vector<4x8x4xbf16>, vector<1x8x4xbf16> -> vector<6x8x4xbf16>
      %66 = vector.extract_strided_slice %65 {offsets = [0, 7, 0], sizes = [6, 1, 4], strides = [1, 1, 1]} : vector<6x8x4xbf16> to vector<6x1x4xbf16>
      %67 = vector.extract_strided_slice %65 {offsets = [0, 0, 0], sizes = [6, 1, 4], strides = [1, 1, 1]} : vector<6x8x4xbf16> to vector<6x1x4xbf16>
      %68 = tpu.concatenate %66, %65, %67 in 1 : vector<6x1x4xbf16>, vector<6x8x4xbf16>, vector<6x1x4xbf16> -> vector<6x10x4xbf16>
      %69 = vector.extract_strided_slice %68 {offsets = [0, 0, 0], sizes = [4, 8, 4], strides = [1, 1, 1]} : vector<6x10x4xbf16> to vector<4x8x4xbf16>
      %70 = vector.shape_cast %69 : vector<4x8x4xbf16> to vector<32x4xbf16>
      %c0_28 = arith.constant 0 : index
      %c0_29 = arith.constant 0 : index
      %71 = vector.load %arg8[%c0_28, %c0_29] : memref<32x36xbf16, #tpu.memory_space<vmem>>, vector<32x4xbf16>
      tpu.vector_store %arg8[%c0_28, %c0_29], %70 {strides = array<i32>} : memref<32x36xbf16, #tpu.memory_space<vmem>>, vector<32x4xbf16>,
      %72 = vector.extract_strided_slice %68 {offsets = [1, 0, 0], sizes = [4, 8, 4], strides = [1, 1, 1]} : vector<6x10x4xbf16> to vector<4x8x4xbf16>
      %73 = vector.shape_cast %72 : vector<4x8x4xbf16> to vector<32x4xbf16>
      %c0_30 = arith.constant 0 : index
      %c4_31 = arith.constant 4 : index
      %74 = vector.load %arg8[%c0_30, %c4_31] : memref<32x36xbf16, #tpu.memory_space<vmem>>, vector<32x4xbf16>
      tpu.vector_store %arg8[%c0_30, %c4_31], %73 {strides = array<i32>} : memref<32x36xbf16, #tpu.memory_space<vmem>>, vector<32x4xbf16>,
      %75 = vector.extract_strided_slice %68 {offsets = [2, 0, 0], sizes = [4, 8, 4], strides = [1, 1, 1]} : vector<6x10x4xbf16> to vector<4x8x4xbf16>
      %76 = vector.shape_cast %75 : vector<4x8x4xbf16> to vector<32x4xbf16>
      %c0_32 = arith.constant 0 : index
      %c8_33 = arith.constant 8 : index
      %77 = vector.load %arg8[%c0_32, %c8_33] : memref<32x36xbf16, #tpu.memory_space<vmem>>, vector<32x4xbf16>
      tpu.vector_store %arg8[%c0_32, %c8_33], %76 {strides = array<i32>} : memref<32x36xbf16, #tpu.memory_space<vmem>>, vector<32x4xbf16>,
      %78 = vector.extract_strided_slice %68 {offsets = [0, 1, 0], sizes = [4, 8, 4], strides = [1, 1, 1]} : vector<6x10x4xbf16> to vector<4x8x4xbf16>
      %79 = vector.shape_cast %78 : vector<4x8x4xbf16> to vector<32x4xbf16>
      %c0_34 = arith.constant 0 : index
      %c12_35 = arith.constant 12 : index
      %80 = vector.load %arg8[%c0_34, %c12_35] : memref<32x36xbf16, #tpu.memory_space<vmem>>, vector<32x4xbf16>
      tpu.vector_store %arg8[%c0_34, %c12_35], %79 {strides = array<i32>} : memref<32x36xbf16, #tpu.memory_space<vmem>>, vector<32x4xbf16>,
      %81 = vector.extract_strided_slice %68 {offsets = [1, 1, 0], sizes = [4, 8, 4], strides = [1, 1, 1]} : vector<6x10x4xbf16> to vector<4x8x4xbf16>
      %82 = vector.shape_cast %81 : vector<4x8x4xbf16> to vector<32x4xbf16>
      %c0_36 = arith.constant 0 : index
      %c16_37 = arith.constant 16 : index
      %83 = vector.load %arg8[%c0_36, %c16_37] : memref<32x36xbf16, #tpu.memory_space<vmem>>, vector<32x4xbf16>
      tpu.vector_store %arg8[%c0_36, %c16_37], %82 {strides = array<i32>} : memref<32x36xbf16, #tpu.memory_space<vmem>>, vector<32x4xbf16>,
      %84 = vector.extract_strided_slice %68 {offsets = [2, 1, 0], sizes = [4, 8, 4], strides = [1, 1, 1]} : vector<6x10x4xbf16> to vector<4x8x4xbf16>
      %85 = vector.shape_cast %84 : vector<4x8x4xbf16> to vector<32x4xbf16>
      %c0_38 = arith.constant 0 : index
      %c20_39 = arith.constant 20 : index
      %86 = vector.load %arg8[%c0_38, %c20_39] : memref<32x36xbf16, #tpu.memory_space<vmem>>, vector<32x4xbf16>
      tpu.vector_store %arg8[%c0_38, %c20_39], %85 {strides = array<i32>} : memref<32x36xbf16, #tpu.memory_space<vmem>>, vector<32x4xbf16>,
      %87 = vector.extract_strided_slice %68 {offsets = [0, 2, 0], sizes = [4, 8, 4], strides = [1, 1, 1]} : vector<6x10x4xbf16> to vector<4x8x4xbf16>
      %88 = vector.shape_cast %87 : vector<4x8x4xbf16> to vector<32x4xbf16>
      %c0_40 = arith.constant 0 : index
      %c24_41 = arith.constant 24 : index
      %89 = vector.load %arg8[%c0_40, %c24_41] : memref<32x36xbf16, #tpu.memory_space<vmem>>, vector<32x4xbf16>
      tpu.vector_store %arg8[%c0_40, %c24_41], %88 {strides = array<i32>} : memref<32x36xbf16, #tpu.memory_space<vmem>>, vector<32x4xbf16>,
      %90 = vector.extract_strided_slice %68 {offsets = [1, 2, 0], sizes = [4, 8, 4], strides = [1, 1, 1]} : vector<6x10x4xbf16> to vector<4x8x4xbf16>
      %91 = vector.shape_cast %90 : vector<4x8x4xbf16> to vector<32x4xbf16>
      %c0_42 = arith.constant 0 : index
      %c28_43 = arith.constant 28 : index
      %92 = vector.load %arg8[%c0_42, %c28_43] : memref<32x36xbf16, #tpu.memory_space<vmem>>, vector<32x4xbf16>
      tpu.vector_store %arg8[%c0_42, %c28_43], %91 {strides = array<i32>} : memref<32x36xbf16, #tpu.memory_space<vmem>>, vector<32x4xbf16>,
      %93 = vector.extract_strided_slice %68 {offsets = [2, 2, 0], sizes = [4, 8, 4], strides = [1, 1, 1]} : vector<6x10x4xbf16> to vector<4x8x4xbf16>
      %94 = vector.shape_cast %93 : vector<4x8x4xbf16> to vector<32x4xbf16>
      %c0_44 = arith.constant 0 : index
      %c32_45 = arith.constant 32 : index
      %95 = vector.load %arg8[%c0_44, %c32_45] : memref<32x36xbf16, #tpu.memory_space<vmem>>, vector<32x4xbf16>
      tpu.vector_store %arg8[%c0_44, %c32_45], %94 {strides = array<i32>} : memref<32x36xbf16, #tpu.memory_space<vmem>>, vector<32x4xbf16>,
    } else {
    }
    %c16_i32 = arith.constant 16 : i32
    %3 = arith.muli %arg1, %c16_i32 : i32
    %4 = tpu.assume_multiple %3, 8 : i32
    %5 = arith.index_cast %4 : i32 to index
    %c0 = arith.constant 0 : index
    %6 = vector.load %arg7[%5, %c0] : memref<32x36xbf16, #tpu.memory_space<vmem>>, vector<16x36xbf16>
    %7 = arith.index_cast %4 : i32 to index
    %c0_1 = arith.constant 0 : index
    %8 = vector.load %arg8[%7, %c0_1] : memref<32x36xbf16, #tpu.memory_space<vmem>>, vector<16x36xbf16>
    %c0_2 = arith.constant 0 : index
    %c0_3 = arith.constant 0 : index
    %9 = vector.load %arg3[%c0_2, %c0_3] : memref<36x32xbf16, #tpu.memory_space<vmem>>, vector<36x32xbf16>
    %c0_4 = arith.constant 0 : index
    %c0_5 = arith.constant 0 : index
    %10 = vector.load %arg4[%c0_4, %c0_5] : memref<36x32xbf16, #tpu.memory_space<vmem>>, vector<36x32xbf16>
    %cst = arith.constant dense<0.000000e+00> : vector<16x32xf32>
    %11 = tpu.matmul %6, %9, %cst {dimension_numbers = #tpu.dot_dimension_numbers<[1], [0], [0], [1], [0, 0, 1, 1], [], []>} : vector<16x36xbf16>, vector<36x32xbf16>, vector<16x32xf32> -> vector<16x32xf32>
    %cst_6 = arith.constant dense<0.000000e+00> : vector<16x32xf32>
    %12 = tpu.matmul %6, %10, %cst_6 {dimension_numbers = #tpu.dot_dimension_numbers<[1], [0], [0], [1], [0, 0, 1, 1], [], []>} : vector<16x36xbf16>, vector<36x32xbf16>, vector<16x32xf32> -> vector<16x32xf32>
    %13 = arith.addf %11, %12 : vector<16x32xf32>
    %cst_7 = arith.constant dense<0.000000e+00> : vector<16x32xf32>
    %14 = tpu.matmul %8, %9, %cst_7 {dimension_numbers = #tpu.dot_dimension_numbers<[1], [0], [0], [1], [0, 0, 1, 1], [], []>} : vector<16x36xbf16>, vector<36x32xbf16>, vector<16x32xf32> -> vector<16x32xf32>
    %15 = arith.addf %13, %14 : vector<16x32xf32>
    %16 = vector.shape_cast %15 : vector<16x32xf32> to vector<2x8x32xf32>
    %c0_8 = arith.constant 0 : index
    %c0_9 = arith.constant 0 : index
    %17 = vector.load %arg5[%c0_8, %c0_9] : memref<8x32xf32, #tpu.memory_space<vmem>>, vector<8x32xf32>
    %18 = vector.shape_cast %17 : vector<8x32xf32> to vector<1x8x32xf32>
    %19 = vector.broadcast %18 : vector<1x8x32xf32> to vector<2x8x32xf32>
    %20 = arith.addf %16, %19 : vector<2x8x32xf32>
    %c0_10 = arith.constant 0 : index
    %c0_11 = arith.constant 0 : index
    %c0_12 = arith.constant 0 : index
    %c0_13 = arith.constant 0 : index
    %21 = vector.load %arg6[%c0_10, %c0_11, %c0_12, %c0_13] : memref<1x2x8x32xf32, #tpu.memory_space<vmem>>, vector<1x2x8x32xf32>
    %22 = vector.shape_cast %21 : vector<1x2x8x32xf32> to vector<2x8x32xf32>
    %23 = vector.shape_cast %20 : vector<2x8x32xf32> to vector<1x2x8x32xf32>
    tpu.vector_store %arg6[%c0_10, %c0_11, %c0_12, %c0_13], %23 {strides = array<i32>} : memref<1x2x8x32xf32, #tpu.memory_space<vmem>>, vector<1x2x8x32xf32>,
    return
  }
  func.func @transform_0(%arg0: i32, %arg1: i32) -> (i32, i32, i32, i32) {
    %c0_i32 = arith.constant 0 : i32
    %c0_i32_0 = arith.constant 0 : i32
    %c0_i32_1 = arith.constant 0 : i32
    %c0_i32_2 = arith.constant 0 : i32
    return %arg0, %c0_i32, %c0_i32_0, %c0_i32_1 : i32, i32, i32, i32
  }
  func.func @transform_1(%arg0: i32, %arg1: i32) -> (i32, i32) {
    %c0_i32 = arith.constant 0 : i32
    %c0_i32_0 = arith.constant 0 : i32
    %c0_i32_1 = arith.constant 0 : i32
    return %c0_i32, %c0_i32_0 : i32, i32
  }
  func.func @transform_2(%arg0: i32, %arg1: i32) -> (i32, i32) {
    %c0_i32 = arith.constant 0 : i32
    %c0_i32_0 = arith.constant 0 : i32
    %c0_i32_1 = arith.constant 0 : i32
    return %c0_i32, %c0_i32_0 : i32, i32
  }
  func.func @transform_3(%arg0: i32, %arg1: i32) -> (i32, i32) {
    %c0_i32 = arith.constant 0 : i32
    %c0_i32_0 = arith.constant 0 : i32
    %c0_i32_1 = arith.constant 0 : i32
    return %c0_i32, %c0_i32_0 : i32, i32
  }
  func.func @transform_4(%arg0: i32, %arg1: i32) -> (i32, i32, i32, i32) {
    %c0_i32 = arith.constant 0 : i32
    %c0_i32_0 = arith.constant 0 : i32
    %c0_i32_1 = arith.constant 0 : i32
    return %arg0, %arg1, %c0_i32, %c0_i32_0 : i32, i32, i32, i32
  }
}

</mosaic_0001>

<bundles_post_ra>
// kernel: data_embedding.1
= control target key start
LH: loop header
LB: loop body
LE: loop exit
PB: predicated region body
PF: predicated region fallthrough
CT: control target
= control target key end

     0   :  { %9 = vsyncpa [#allocation5], 0  ;;  %s2010_s0 = inlined_call_operand.vmem [shape: f32[2,4,8,4], index: 0, kind: input, shape index: {}]   ;;  %s2011_s1 = inlined_call_operand.vmem [shape: bf16[36,32], index: 1, kind: input, shape index: {}]   ;;  %s2012_s2 = inlined_call_operand.vmem [shape: bf16[36,32], index: 2, kind: input, shape index: {}]   ;;  %s2013_s3 = inlined_call_operand.vmem [shape: f32[8,32], index: 3, kind: input, shape index: {}]   ;;  %s2014_s4 = inlined_call_operand.hbm [shape: f32[2,4,8,32], index: 4, kind: output, shape index: {}]  }
   0x1   :  { %11 = vsyncpa [#allocation5 + $0x1], 0  ;;  %s1438_s15 = smov 0   ;;  %s1440_s16 = smov 0  }
   0x2   :  { %s1442_s17 = smov 0   ;;  %s1444_s18 = smov 0  }
   0x3   :  { %s1446_s19 = smov 0   ;;  %s1448_s20 = smov 0  }
   0x4   :  { %s1450_s21 = smov 0   ;;  %s1452_s22 = smov 0  }
   0x5 LB: > { %s1119_s23 = sadd.s32 4294967295, %s1398_s22   ;;  %s1120_s24 = sadd.s32 4294967294, %s1398_s22   ;;  %s1398_s22 = sphi %s1452_s22, %s17_s22   ;;  %s1394_s21 = sphi %s1450_s21, %s2031_s21   ;;  %s1390_s20 = sphi %s1448_s20, %s2030_s20   ;;  %s1386_s19 = sphi %s1446_s19, %s2029_s19   ;;  %s1382_s18 = sphi %s1444_s18, %s2028_s18   ;;  %s1378_s17 = sphi %s1442_s17, %s2027_s17   ;;  %s1374_s16 = sphi %s1440_s16, %s2026_s16   ;;  %s1370_s15 = sphi %s1438_s15, %s2025_s15  }
   0x6   : > { %s26_s25 = sadd.s32 1, %s1390_s20  ;;  %s29_s26 = sadd.s32 1, %s1394_s21 }
   0x7   : > { %p27_p0 = scmp.ge.s32.totalorder %s26_s25, 2  ;;  %p137_p1 = scmp.ne.s32.totalorder %s1378_s17, %s1374_s16 }
   0x8   : > { %p138_p2 = scmp.eq.s32.totalorder %s1119_s23, 3  ;;  %p143_p5 = scmp.ne.s32.totalorder %s1374_s16, %s1370_s15 }
   0x9   : > { %s2033_s25 = smov (%p27_p0, %s26_s25), 0  ;;  %s2035_s26 = smov (!%p27_p0, %s29_s26), %s1394_s21 }
   0xa   : > { %s123_s27 = ssub.s32 %s1390_s20, %s2033_s25  ;;  %p1489_p3 = por %p138_p2, %p137_p1 }
   0xb   : > { %p31_p4 = scmp.ge.s32.totalorder %s2035_s26, 2  ;;  %p144_p6 = scmp.eq.s32.totalorder %s1120_s24, 3 }
   0xc   : > { %p1123_p7 = scmp.ge.s32.totalorder %s1398_s22, 1  ;;  %p179_p9 = scmp.lt.s32.totalorder %s1398_s22, 5 }
   0xd   : > { %s2037_s26 = smov (%p31_p4, %s2035_s26), 0  ;;  %p1498_p8 = por %p144_p6, %p143_p5 }
   0xe   : > { %s122_s30 = ssub.s32 %s1394_s21, %s2037_s26  ;;  %s127_s5 = sadd.s32 1, %s1378_s17 }
   0xf   : > { %s124_s6 = sor.u32 %s123_s27, %s122_s30  ;;  %p180_p10 = pnand %p1123_p7, %p179_p9 }
  0x10   : > { %p125_p11 = scmp.eq.s32.totalorder %s124_s6, 0  ;;  %s202_s8 = sand.u32 (!%p180_p10), 1, %s1374_s16  }
  0x11   : > { %183 = sbr.rel (%p180_p10) target bundleno = 520 (0x208), region = 36  ;;  %p205_p12 = scmp.lt.s32.totalorder (!%p180_p10), %s1386_s19, 1 }
  0x12   : > { %s1507_s7 = scalar_select %p125_p11, %s1378_s17, %s127_s5  }
  0x13   : > { %s1124_s9 = sshll.u32 (!%p180_p10), %s202_s8, 4  ;;  %p1127_p13 = scmp.ne.s32.totalorder (!%p180_p10), %s1382_s18, 0 }
  0x14   : > { %s1517_s23 = scalar_lea.vmem (!%p180_p10), [#allocation4], %s1124_s9 }
  0x16   : > { %s206_s10 = scalar_select %p205_p12, %s1386_s19, 1 }
  0x17   : > { %215 = sbr.rel (%p1127_p13) target bundleno = 280 (0x118), region = 40  ;;  %s1400_s24 = smov (!%p1127_p13), 4  }
  0x18   : > { %s1172_s11 = sshll.u32 %s206_s10, 5  ;;  %s1401_s27 = smov (!%p1127_p13), 8  }
  0x19   : > { %s209_s14 = scalar_lea.vmem %s2010_s0, %s1172_s11  ;;  %s1402_s30 = smov (!%p1127_p13), 12  }
  0x1a   : > { %s1403_s5 = smov (!%p1127_p13), 16   ;;  %s1404_s6 = smov (!%p1127_p13), 20  }
  0x1b   : > { %s1405_s9 = smov (!%p1127_p13), 24   ;;  %s1406_s10 = smov (!%p1127_p13), 28  }
  0x1c   : > { %v1520_v0 = vld [vmem:[%s209_s14 + $0x10] sm:$0xff]  ;;  %vm284_vm0 = vcmask 1040384   ;;  %v1526_v2 = vld [vmem:[%s209_s14] sm:$0xff]  ;;  %v1528_v3 = vld [vmem:[%s209_s14 + $0x18] sm:$0xff]  ;;  %vm285_vm1 = vsmask.f32 256 }
  0x1d   : > { %v1524_v1 = vpack.c.bf16 %v1520_v0, %v1520_v0  ;;  %vm291_vm2 = vcmask 1044480   ;;  %v1532_v4 = vpack.c.bf16 %v1526_v2, %v1526_v2  ;;  %v1536_v5 = vpack.c.bf16 %v1528_v3, %v1528_v3  ;;  %v1538_v6 = vld [vmem:[%s209_s14 + $0x8] sm:$0xff]  ;;  %vm1553_vm4 = vmand %vm284_vm0, %vm285_vm1  ;;  %s1407_s11 = smov 32  }
  0x1e   : > { %vm292_vm3 = vsmask.f32 4352  ;;  %v1544_v9 = vpack.c.bf16 %v1538_v6, %v1538_v6  ;;  %vm357_vm6 = vsmask.f32 3328  ;;  %vm358_vm7 = vsmask.f32 7440 }
  0x1f   : > { %v249_v7 = vshrl.u32 %v1524_v1, 16  ;;  %v269_v8 = vshll.u32 %v1524_v1, 16  ;;  %v241_v10 = vshrl.u32 %v1532_v4, 16  ;;  %v261_v11 = vshll.u32 %v1532_v4, 16  ;;  %vm1559_vm5 = vmand %vm291_vm2, %vm292_vm3 }
  0x20   : > { %v237_v12 = vshrl.u32 %v1536_v5, 16  ;;  %v257_v13 = vshll.u32 %v1536_v5, 16  ;;  %v245_v16 = vshrl.u32 %v1544_v9, 16  ;;  %v265_v30 = vshll.u32 %v1544_v9, 16  ;;  %vm1648_vm8 = vmor %vm357_vm6, %vm358_vm7 }
  0x21   : > { %v251_v14 = vrot.slane %v249_v7, 3  ;;  %v268_v15 = vrot.slane %v249_v7, 7  ;;  %v279_v17 = vrot.slane %v269_v8, 4  ;;  %v243_v19 = vrot.slane %v241_v10, 3 }
  0x22   : > { %v260_v20 = vrot.slane %v241_v10, 7  ;;  %v277_v21 = vrot.slane %v261_v11, 4  ;;  %v239_v24 = vrot.slane %v237_v12, 3  ;;  %v256_v25 = vrot.slane %v237_v12, 7 }
  0x23   : > { %v271_v22 = vor.u32 %v269_v8, %v268_v15  ;;  %v276_v26 = vrot.slane %v257_v13, 4  ;;  %v247_v28 = vrot.slane %v245_v16, 3  ;;  %v264_v29 = vrot.slane %v245_v16, 7 }
  0x24   : > { %v263_v27 = vor.u32 %v261_v11, %v260_v20  ;;  %v259_v32 = vor.u32 %v257_v13, %v256_v25  ;;  %v278_v36 = vrot.slane %v265_v30, 4  ;;  %v225_v8 = vunpack.c.l.bf16 %v1544_v9 }
  0x25   : > { %v290_v31 = vsel %vm1553_vm4, %v251_v14, %v271_v22  ;;  %v267_v35 = vor.u32 %v265_v30, %v264_v29  ;;  %v224_v10 = vunpack.c.l.bf16 %v1532_v4  ;;  %vm298_vm9 = vcmask 27648  }
  0x26   : > { %v1568_v33 = vsel %vm1559_vm5, %v290_v31, %v279_v17  ;;  %v288_v34 = vsel %vm1553_vm4, %v243_v19, %v263_v27  ;;  %v287_v39 = vsel %vm1553_vm4, %v239_v24, %v259_v32  ;;  %v229_v31 = vsub.f32 %v1538_v6, %v225_v8 }
  0x27   : > { %311 = vrot.lane.b32.xlu1 %v1568_v33, %s1400_s24  ;;  %v1576_v37 = vcombine.low %v1568_v33, %v1568_v33  ;;  %v1580_v38 = vsel %vm1559_vm5, %v288_v34, %v277_v21  ;;  %v1592_v41 = vsel %vm1559_vm5, %v287_v39, %v276_v26  ;;  %v289_v42 = vsel %vm1553_vm4, %v247_v28, %v267_v35 }
  0x28   : > { %307 = vrot.lane.b32.xlu0 %v1580_v38, %s1400_s24  ;;  %v1588_v40 = vcombine.low %v1580_v38, %v1580_v38  ;;  %v1598_v43 = vcombine.high %v1580_v38, %v1580_v38  ;;  %v1602_v44 = vcombine.low %v1592_v41, %v1592_v41  ;;  %v1606_v45 = vsel %vm1559_vm5, %v289_v42, %v278_v36 }
  0x29   : > { %v1610_v46 = vcombine.high %v1592_v41, %v1592_v41  ;;  %v1614_v47 = vcombine.low %v1606_v45, %v1606_v45  ;;  %v1620_v50 = vcombine.high %v1568_v33, %v1568_v33  ;;  %v403_v54 = vshrl.u32 %v1576_v37, 16  ;;  %301 = vst.msk [vmem:[#allocation2 + $0x8] sm:$0xf] %vm298_vm9, %v1606_v45  ;;  %299 = vst.msk [vmem:[#allocation2] sm:$0xf] %vm298_vm9, %v1592_v41 }
  0x2a   : > { %v375_v48 = vshrl.u32 %v1588_v40, 16  ;;  %v378_v49 = vshll.u32 %v1588_v40, 16  ;;  %v361_v51 = vshrl.u32 %v1602_v44, 16  ;;  %v364_v52 = vshll.u32 %v1602_v44, 16  ;;  %300 = vst.msk [vmem:[#allocation2 + $0x4] sm:$0xf] %vm298_vm9, %v1580_v38 }
  0x2b   : > { %313 = vrot.lane.b32.xlu1 %v1592_v41, %s1400_s24  ;;  %v384_v53 = vshll.u32 %v1598_v43, 16  ;;  %v1632_v57 = vcombine.high %v1606_v45, %v1606_v45  ;;  %v389_v58 = vshrl.u32 %v1614_v47, 16  ;;  %v370_v61 = vshll.u32 %v1610_v46, 16  ;;  %302 = vst.msk [vmem:[#allocation2 + $0xc] sm:$0xf] %vm298_vm9, %v1568_v33 }
  0x2c   : > { %309 = vrot.lane.b32.xlu0 %v1606_v45, %s1400_s24  ;;  %v377_v55 = vrot.slane %v375_v48, 4  ;;  %v380_v56 = vrot.slane %v378_v49, 5  ;;  %v363_v59 = vrot.slane %v361_v51, 4  ;;  %v366_v60 = vrot.slane %v364_v52, 5 }
  0x2d   : > { %v392_v62 = vshll.u32 %v1614_v47, 16  ;;  %v391_v7 = vrot.slane %v389_v58, 4  ;;  %v405_v13 = vrot.slane %v403_v54, 4  ;;  %v406_v14 = vshll.u32 %v1576_v37, 16 }
  0x2e   : > { %v381_v63 = vor.u32 %v380_v56, %v377_v55  ;;  %v367_v11 = vor.u32 %v366_v60, %v363_v59  ;;  %v386_v16 = vrot.slane %v384_v53, 5  ;;  %v398_v17 = vshll.u32 %v1632_v57, 16 }
  0x2f   : > { %326 = vrot.lane.b32.xlu1 %v1568_v33, %s1401_s27  ;;  %v394_v12 = vrot.slane %v392_v62, 5  ;;  %v412_v9 = vshll.u32 %v1620_v50, 16  ;;  %v372_v20 = vrot.slane %v370_v61, 5  ;;  %v408_v22 = vrot.slane %v406_v14, 5 }
  0x30   : > { %324 = vrot.lane.b32.xlu0 %v1606_v45, %s1401_s27  ;;  %v382_v15 = vrot.slane %v381_v63, 4  ;;  %v368_v19 = vrot.slane %v367_v11, 4  ;;  %v400_v27 = vrot.slane %v398_v17, 5  ;;  %v228_v32 = vsub.f32 %v1526_v2, %v224_v10 }
  0x31   : > { %v395_v21 = vor.u32 %v394_v12, %v391_v7  ;;  %v409_v24 = vor.u32 %v408_v22, %v405_v13  ;;  %v414_v28 = vrot.slane %v412_v9, 5  ;;  %v227_v34 = vunpack.c.l.bf16 %v1536_v5 }
  0x32   : > { %v1658_v25 = vsel %vm1648_vm8, %v382_v15, %v386_v16  ;;  %v1662_v29 = vsel %vm1648_vm8, %v368_v19, %v372_v20  ;;  %v226_v35 = vunpack.c.l.bf16 %v1524_v1  ;;  %v233_v36 = vpack.c.bf16 %v229_v31, %v229_v31 }
  0x33   : > { %330 = vrot.lane.b32.xlu1 %v1580_v38, %s1401_s27  ;;  %v396_v26 = vrot.slane %v395_v21, 4  ;;  %v410_v30 = vrot.slane %v409_v24, 4  ;;  %v232_v39 = vpack.c.bf16 %v228_v32, %v228_v32  ;;  %v231_v5 = vsub.f32 %v1528_v3, %v227_v34 }
  0x34   : > { %328 = vrot.lane.b32.xlu0 %v1592_v41, %s1401_s27  ;;  %v230_v1 = vsub.f32 %v1520_v0, %v226_v35  ;;  %v546_v6 = vshrl.u32 %v233_v36, 16  ;;  %v566_v48 = vshll.u32 %v233_v36, 16  ;;  %vm467_vm10 = vcmask 1042432  }
  0x35   : > { %v401_v42 = vsel %vm1648_vm8, %v396_v26, %v400_v27  ;;  %v415_v2 = vsel %vm1648_vm8, %v410_v30, %v414_v28  ;;  %v542_v49 = vshrl.u32 %v232_v39, 16  ;;  %v562_v51 = vshll.u32 %v232_v39, 16 }
  0x36   : > { %v235_v52 = vpack.c.bf16 %v231_v5, %v231_v5  ;;  %v234_v3 = vpack.c.bf16 %v230_v1, %v230_v1  ;;  %v548_v0 = vrot.slane %v546_v6, 3  ;;  %v565_v53 = vrot.slane %v546_v6, 7 }
  0x37   : > { %418 = vrot.lane.b32.xlu1 %v1658_v25, %s1402_s30  ;;  %v579_v45 = vrot.slane %v566_v48, 4  ;;  %v544_v41 = vrot.slane %v542_v49, 3  ;;  %v561_v54 = vrot.slane %v542_v49, 7  ;;  %v578_v58 = vrot.slane %v562_v51, 4 }
  0x38   : > { %416 = vrot.lane.b32.xlu0 %v1662_v29, %s1402_s30  ;;  %v538_v55 = vshrl.u32 %v235_v52, 16  ;;  %v558_v38 = vshll.u32 %v235_v52, 16  ;;  %v568_v56 = vor.u32 %v566_v48, %v565_v53  ;;  %v550_v33 = vshrl.u32 %v234_v3, 16 }
  0x39   : > { %v570_v59 = vshll.u32 %v234_v3, 16  ;;  %v564_v60 = vor.u32 %v562_v51, %v561_v54  ;;  %vm468_vm11 = vcmask 1046532   ;;  %v1137_v18 = vrot.slane %v1588_v40, 9 }
  0x3a   : > { %v540_v61 = vrot.slane %v538_v55, 3  ;;  %v557_v62 = vrot.slane %v538_v55, 7  ;;  %v587_v63 = vsel %vm1553_vm4, %v548_v0, %v568_v56  ;;  %v577_v7 = vrot.slane %v558_v38, 4  ;;  %vm1730_vm12 = vmor %vm467_vm10, %vm468_vm11 }
  0x3b   : > { %422 = vrot.lane.b32.xlu1 %v415_v2, %s1402_s30  ;;  %v552_v8 = vrot.slane %v550_v33, 3  ;;  %v569_v10 = vrot.slane %v550_v33, 7  ;;  %v1695_v11 = vsel %vm1559_vm5, %v587_v63, %v579_v45  ;;  %v586_v12 = vsel %vm1553_vm4, %v544_v41, %v564_v60 }
  0x3c   : > { %420 = vrot.lane.b32.xlu0 %v401_v42, %s1402_s30  ;;  %v560_v13 = vor.u32 %v558_v38, %v557_v62  ;;  %v580_v14 = vrot.slane %v570_v59, 4  ;;  %v1701_v15 = vsel %vm1559_vm5, %v586_v12, %v578_v58  ;;  %595 = vst.msk [vmem:[#allocation3 + $0x8] sm:$0xf] %vm298_vm9, %v1695_v11  ;;  %v476_v21 = vrot.slane %v1598_v43, 5 }
  0x3d   : > { %v572_v16 = vor.u32 %v570_v59, %v569_v10  ;;  %594 = vst.msk [vmem:[#allocation3 + $0x4] sm:$0xf] %vm298_vm9, %v1701_v15  ;;  %v1136_v22 = vrot.slane %v1602_v44, 9  ;;  %v472_v24 = vrot.slane %v1610_v46, 5  ;;  %v1139_v40 = vrot.slane %v1576_v37, 9 }
  0x3e   : > { %v585_v17 = vsel %vm1553_vm4, %v540_v61, %v560_v13  ;;  %v477_v26 = vsel %vm1730_vm12, %v1137_v18, %v476_v21  ;;  %v484_v43 = vrot.slane %v1620_v50, 5  ;;  %v1138_v44 = vrot.slane %v1614_v47, 9 }
  0x3f   : > { %435 = vrot.lane.b32.xlu1 %v401_v42, %s1403_s5  ;;  %v1713_v9 = vsel %vm1559_vm5, %v585_v17, %v577_v7  ;;  %v588_v19 = vsel %vm1553_vm4, %v552_v8, %v572_v16  ;;  %v473_v27 = vsel %vm1730_vm12, %v1136_v22, %v472_v24  ;;  %v480_v46 = vrot.slane %v1632_v57, 5 }
  0x40   : > { %433 = vrot.lane.b32.xlu0 %v1658_v25, %s1403_s5  ;;  %v1720_v20 = vsel %vm1559_vm5, %v588_v19, %v580_v14  ;;  %593 = vst.msk [vmem:[#allocation3] sm:$0xf] %vm298_vm9, %v1713_v9  ;;  %v1764_v47 = vcombine.low %v1701_v15, %v1701_v15  ;;  %v1768_v50 = vcombine.low %v1713_v9, %v1713_v9  ;;  %vm319_vm13 = vcmask 60448  }
  0x41   : > { %596 = vst.msk [vmem:[#allocation3 + $0xc] sm:$0xf] %vm298_vm9, %v1720_v20  ;;  %v481_v37 = vsel %vm1730_vm12, %v1138_v44, %v480_v46  ;;  %v1773_v57 = vcombine.low %v1695_v11, %v1695_v11  ;;  %v1778_v28 = vcombine.low %v1720_v20, %v1720_v20  ;;  %v1143_v34 = vcombine.high %v1701_v15, %v1701_v15 }
  0x42   : > { %v667_v30 = vshll.u32 %v1764_v47, 16  ;;  %v650_v31 = vshrl.u32 %v1768_v50, 16  ;;  %v653_v32 = vshll.u32 %v1768_v50, 16  ;;  %v1141_v5 = vcombine.high %v1713_v9, %v1713_v9 }
  0x43   : > { %439 = vrot.lane.b32.xlu1 %v1662_v29, %s1403_s5  ;;  %v678_v35 = vshrl.u32 %v1773_v57, 16  ;;  %v681_v48 = vshll.u32 %v1773_v57, 16  ;;  %v673_v49 = vshll.u32 %v1143_v34, 16  ;;  %v1145_v51 = vcombine.high %v1695_v11, %v1695_v11 }
  0x44   : > { %437 = vrot.lane.b32.xlu0 %v415_v2, %s1403_s5  ;;  %v669_v39 = vrot.slane %v667_v30, 5  ;;  %v652_v1 = vrot.slane %v650_v31, 4  ;;  %v655_v6 = vrot.slane %v653_v32, 5  ;;  %v1147_v3 = vcombine.high %v1720_v20, %v1720_v20 }
  0x45   : > { %v659_v41 = vshll.u32 %v1141_v5, 16  ;;  %v680_v54 = vrot.slane %v678_v35, 4  ;;  %v683_v55 = vrot.slane %v681_v48, 5  ;;  %v675_v56 = vrot.slane %v673_v49, 5 }
  0x46   : > { %v656_v45 = vor.u32 %v655_v6, %v652_v1  ;;  %v701_v33 = vshll.u32 %v1147_v3, 16  ;;  %v687_v62 = vshll.u32 %v1145_v51, 16  ;;  %v759_v4 = vrot.slane %v1143_v34, 5 }
  0x47   : > { %452 = vrot.lane.b32.xlu1 %v415_v2, %s1404_s6  ;;  %v695_v2 = vshll.u32 %v1778_v28, 16  ;;  %v661_v60 = vrot.slane %v659_v41, 5  ;;  %v684_v61 = vor.u32 %v683_v55, %v680_v54  ;;  %v1148_v16 = vrot.slane %v1768_v50, 9 }
  0x48   : > { %450 = vrot.lane.b32.xlu0 %v401_v42, %s1404_s6  ;;  %v692_v42 = vshrl.u32 %v1778_v28, 16  ;;  %v657_v59 = vrot.slane %v656_v45, 4  ;;  %v703_v8 = vrot.slane %v701_v33, 5  ;;  %v689_v12 = vrot.slane %v687_v62, 5 }
  0x49   : > { %v697_v53 = vrot.slane %v695_v2, 5  ;;  %v755_v17 = vrot.slane %v1141_v5, 5  ;;  %v1151_v19 = vrot.slane %v1778_v28, 9  ;;  %v1150_v21 = vrot.slane %v1773_v57, 9 }
  0x4a   : > { %v694_v0 = vrot.slane %v692_v42, 4  ;;  %v662_v10 = vsel %vm1648_vm8, %v657_v59, %v661_v60  ;;  %v763_v22 = vrot.slane %v1145_v51, 5  ;;  %vm336_vm14 = vcmask 93248  }
  0x4b   : > { %456 = vrot.lane.b32.xlu1 %v1658_v25, %s1404_s6  ;;  %v485_v25 = vsel %vm1730_vm12, %v1139_v40, %v484_v43  ;;  %v756_v18 = vsel %vm1730_vm12, %v1148_v16, %v755_v17  ;;  %vm428_vm15 = vcmask 126048   ;;  %vm445_vm0 = vcmask 158848  }
  0x4c   : > { %454 = vrot.lane.b32.xlu0 %v1662_v29, %s1404_s6  ;;  %v664_v29 = vshrl.u32 %v1764_v47, 16  ;;  %v698_v58 = vor.u32 %v697_v53, %v694_v0  ;;  %vm462_vm1 = vcmask 191648   ;;  %vm498_vm2 = vcmask 224448  }
  0x4d   : > { %vm515_vm3 = vcmask 257248   ;;  %vm532_vm4 = vcmask 290048  }
  0x4e   : > { %v666_v36 = vrot.slane %v664_v29, 4  ;;  %v699_v7 = vrot.slane %v698_v58, 4 }
  0x4f   : > { %488 = vrot.lane.b32.xlu1 %v477_v26, %s1405_s9 }
  0x50   : > { %486 = vrot.lane.b32.xlu0 %v473_v27, %s1405_s9  ;;  %v670_v52 = vor.u32 %v669_v39, %v666_v36  ;;  %v704_v13 = vsel %vm1648_vm8, %v699_v7, %v703_v8 }
  0x52   : > { %v671_v38 = vrot.slane %v670_v52, 4 }
  0x53   : > { %492 = vrot.lane.b32.xlu1 %v485_v25, %s1405_s9 }
  0x54   : > { %490 = vrot.lane.b32.xlu0 %v481_v37, %s1405_s9  ;;  %v676_v63 = vsel %vm1648_vm8, %v671_v38, %v675_v56 }
  0x57   : > { %505 = vrot.lane.b32.xlu1 %v481_v37, %s1406_s10 }
  0x58   : > { %503 = vrot.lane.b32.xlu0 %v477_v26, %s1406_s10 }
  0x5b   : > { %509 = vrot.lane.b32.xlu1 %v473_v27, %s1406_s10 }
  0x5c   : > { %507 = vrot.lane.b32.xlu0 %v485_v25, %s1406_s10 }
  0x5f   : > { %522 = vrot.lane.b32.xlu1 %v485_v25, %s1407_s11 }
  0x60   : > { %520 = vrot.lane.b32.xlu0 %v481_v37, %s1407_s11 }
  0x63   : > { %526 = vrot.lane.b32.xlu1 %v477_v26, %s1407_s11  ;;  %v764_v26 = vsel %vm1730_vm12, %v1150_v21, %v763_v22 }
  0x64   : > { %524 = vrot.lane.b32.xlu0 %v473_v27, %s1407_s11 }
  0x67   : > { %603 = vrot.lane.b32.xlu1 %v1695_v11, %s1400_s24 }
  0x68   : > { %601 = vrot.lane.b32.xlu0 %v1701_v15, %s1400_s24 }
  0x6b   : > { %607 = vrot.lane.b32.xlu1 %v1713_v9, %s1400_s24 }
  0x6c   : > { %605 = vrot.lane.b32.xlu0 %v1720_v20, %s1400_s24 }
  0x6f   : > { %619 = vrot.lane.b32.xlu1 %v1720_v20, %s1401_s27  ;;  %v767_v20 = vrot.slane %v1147_v3, 5 }
  0x70   : > { %617 = vrot.lane.b32.xlu0 %v1695_v11, %s1401_s27  ;;  %v685_v11 = vrot.slane %v684_v61, 4 }
  0x71   : > { %v768_v24 = vsel %vm1730_vm12, %v1151_v19, %v767_v20 }
  0x72   : > { %v690_v14 = vsel %vm1648_vm8, %v685_v11, %v689_v12 }
  0x73   : > { %623 = vrot.lane.b32.xlu1 %v1701_v15, %s1401_s27  ;;  %v1149_v15 = vrot.slane %v1764_v47, 9 }
  0x74   : > { %621 = vrot.lane.b32.xlu0 %v1713_v9, %s1401_s27 }
  0x75   : > { %v760_v9 = vsel %vm1730_vm12, %v1149_v15, %v759_v4 }
  0x77   : > { %707 = vrot.lane.b32.xlu1 %v676_v63, %s1402_s30 }
  0x78   : > { %705 = vrot.lane.b32.xlu0 %v662_v10, %s1402_s30 }
  0x7b   : > { %711 = vrot.lane.b32.xlu1 %v704_v13, %s1402_s30 }
  0x7c   : > { %709 = vrot.lane.b32.xlu0 %v690_v14, %s1402_s30 }
  0x7f   : > { %723 = vrot.lane.b32.xlu1 %v690_v14, %s1403_s5 }
  0x80   : > { %721 = vrot.lane.b32.xlu0 %v676_v63, %s1403_s5 }
  0x83   : > { %727 = vrot.lane.b32.xlu1 %v662_v10, %s1403_s5 }
  0x84   : > { %725 = vrot.lane.b32.xlu0 %v704_v13, %s1403_s5 }
  0x87   : > { %739 = vrot.lane.b32.xlu1 %v704_v13, %s1404_s6 }
  0x88   : > { %737 = vrot.lane.b32.xlu0 %v690_v14, %s1404_s6 }
  0x8b   : > { %743 = vrot.lane.b32.xlu1 %v676_v63, %s1404_s6 }
  0x8c   : > { %741 = vrot.lane.b32.xlu0 %v662_v10, %s1404_s6 }
  0x8f   : > { %771 = vrot.lane.b32.xlu1 %v760_v9, %s1405_s9 }
  0x90   : > { %769 = vrot.lane.b32.xlu0 %v756_v18, %s1405_s9 }
  0x93   : > { %775 = vrot.lane.b32.xlu1 %v768_v24, %s1405_s9 }
  0x94   : > { %773 = vrot.lane.b32.xlu0 %v764_v26, %s1405_s9 }
  0x97   : > { %787 = vrot.lane.b32.xlu1 %v764_v26, %s1406_s10 }
  0x98   : > { %785 = vrot.lane.b32.xlu0 %v760_v9, %s1406_s10 }
  0x99   : > { %v312_v40 = vpop.permute.xlu1 %311 }
  0x9a   : > { %322 = vst.msk [vmem:[#allocation2 + $0x8] sm:$0xf] %vm319_vm13, %v312_v40  ;;  %v308_v43 = vpop.permute.xlu0 %307 }
  0x9b   : > { %320 = vst.msk [vmem:[#allocation2] sm:$0xf] %vm319_vm13, %v308_v43  ;;  %791 = vrot.lane.b32.xlu1 %v756_v18, %s1406_s10 }
  0x9c   : > { %789 = vrot.lane.b32.xlu0 %v768_v24, %s1406_s10 }
  0x9d   : > { %v314_v23 = vpop.permute.xlu1 %313 }
  0x9e   : > { %323 = vst.msk [vmem:[#allocation2 + $0xc] sm:$0xf] %vm319_vm13, %v314_v23  ;;  %v310_v27 = vpop.permute.xlu0 %309 }
  0x9f   : > { %321 = vst.msk [vmem:[#allocation2 + $0x4] sm:$0xf] %vm319_vm13, %v310_v27  ;;  %803 = vrot.lane.b32.xlu1 %v768_v24, %s1407_s11 }
  0xa0   : > { %801 = vrot.lane.b32.xlu0 %v764_v26, %s1407_s11 }
  0xa1   : > { %v327_v44 = vpop.permute.xlu1 %326 }
  0xa2   : > { %338 = vst.msk [vmem:[#allocation2 + $0x4] sm:$0xf] %vm336_vm14, %v327_v44  ;;  %v325_v46 = vpop.permute.xlu0 %324 }
  0xa3   : > { %337 = vst.msk [vmem:[#allocation2] sm:$0xf] %vm336_vm14, %v325_v46  ;;  %807 = vrot.lane.b32.xlu1 %v760_v9, %s1407_s11 }
  0xa4   : > { %805 = vrot.lane.b32.xlu0 %v756_v18, %s1407_s11 }
  0xa5   : > { %v331_v25 = vpop.permute.xlu1 %330 }
  0xa6   : > { %340 = vst.msk [vmem:[#allocation2 + $0xc] sm:$0xf] %vm336_vm14, %v331_v25  ;;  %v329_v37 = vpop.permute.xlu0 %328 }
  0xa7   : > { %339 = vst.msk [vmem:[#allocation2 + $0x8] sm:$0xf] %vm336_vm14, %v329_v37 }
  0xa9   : > { %v419_v47 = vpop.permute.xlu1 %418 }
  0xaa   : > { %v417_v50 = vpop.permute.xlu0 %416  ;;  %430 = vst.msk [vmem:[#allocation2 + $0x4] sm:$0xf] %vm428_vm15, %v419_v47 }
  0xab   : > { %429 = vst.msk [vmem:[#allocation2] sm:$0xf] %vm428_vm15, %v417_v50 }
  0xad   : > { %v423_v57 = vpop.permute.xlu1 %422 }
  0xae   : > { %v421_v28 = vpop.permute.xlu0 %420  ;;  %432 = vst.msk [vmem:[#allocation2 + $0xc] sm:$0xf] %vm428_vm15, %v423_v57 }
  0xaf   : > { %431 = vst.msk [vmem:[#allocation2 + $0x8] sm:$0xf] %vm428_vm15, %v421_v28 }
  0xb1   : > { %v436_v29 = vpop.permute.xlu1 %435 }
  0xb2   : > { %v434_v30 = vpop.permute.xlu0 %433  ;;  %447 = vst.msk [vmem:[#allocation2 + $0x4] sm:$0xf] %vm445_vm0, %v436_v29 }
  0xb3   : > { %446 = vst.msk [vmem:[#allocation2] sm:$0xf] %vm445_vm0, %v434_v30 }
  0xb5   : > { %v440_v31 = vpop.permute.xlu1 %439 }
  0xb6   : > { %v438_v32 = vpop.permute.xlu0 %437  ;;  %449 = vst.msk [vmem:[#allocation2 + $0xc] sm:$0xf] %vm445_vm0, %v440_v31 }
  0xb7   : > { %448 = vst.msk [vmem:[#allocation2 + $0x8] sm:$0xf] %vm445_vm0, %v438_v32 }
  0xb9   : > { %v453_v34 = vpop.permute.xlu1 %452 }
  0xba   : > { %v451_v35 = vpop.permute.xlu0 %450  ;;  %464 = vst.msk [vmem:[#allocation2 + $0x4] sm:$0xf] %vm462_vm1, %v453_v34 }
  0xbb   : > { %463 = vst.msk [vmem:[#allocation2] sm:$0xf] %vm462_vm1, %v451_v35 }
  0xbd   : > { %v457_v36 = vpop.permute.xlu1 %456 }
  0xbe   : > { %v455_v39 = vpop.permute.xlu0 %454  ;;  %466 = vst.msk [vmem:[#allocation2 + $0xc] sm:$0xf] %vm462_vm1, %v457_v36 }
  0xbf   : > { %465 = vst.msk [vmem:[#allocation2 + $0x8] sm:$0xf] %vm462_vm1, %v455_v39 }
  0xc1   : > { %v489_v42 = vpop.permute.xlu1 %488 }
  0xc2   : > { %v487_v2 = vpop.permute.xlu0 %486  ;;  %500 = vst.msk [vmem:[#allocation2 + $0x4] sm:$0xf] %vm498_vm2, %v489_v42 }
  0xc3   : > { %499 = vst.msk [vmem:[#allocation2] sm:$0xf] %vm498_vm2, %v487_v2 }
  0xc5   : > { %v493_v5 = vpop.permute.xlu1 %492 }
  0xc6   : > { %v491_v1 = vpop.permute.xlu0 %490  ;;  %502 = vst.msk [vmem:[#allocation2 + $0xc] sm:$0xf] %vm498_vm2, %v493_v5 }
  0xc7   : > { %501 = vst.msk [vmem:[#allocation2 + $0x8] sm:$0xf] %vm498_vm2, %v491_v1 }
  0xc9   : > { %v506_v6 = vpop.permute.xlu1 %505 }
  0xca   : > { %v504_v48 = vpop.permute.xlu0 %503  ;;  %517 = vst.msk [vmem:[#allocation2 + $0x4] sm:$0xf] %vm515_vm3, %v506_v6 }
  0xcb   : > { %516 = vst.msk [vmem:[#allocation2] sm:$0xf] %vm515_vm3, %v504_v48 }
  0xcd   : > { %v510_v49 = vpop.permute.xlu1 %509 }
  0xce   : > { %v508_v51 = vpop.permute.xlu0 %507  ;;  %519 = vst.msk [vmem:[#allocation2 + $0xc] sm:$0xf] %vm515_vm3, %v510_v49 }
  0xcf   : > { %518 = vst.msk [vmem:[#allocation2 + $0x8] sm:$0xf] %vm515_vm3, %v508_v51 }
  0xd1   : > { %v523_v52 = vpop.permute.xlu1 %522 }
  0xd2   : > { %v521_v3 = vpop.permute.xlu0 %520  ;;  %534 = vst.msk [vmem:[#allocation2 + $0x4] sm:$0xf] %vm532_vm4, %v523_v52 }
  0xd3   : > { %533 = vst.msk [vmem:[#allocation2] sm:$0xf] %vm532_vm4, %v521_v3 }
  0xd5   : > { %v527_v0 = vpop.permute.xlu1 %526 }
  0xd6   : > { %v525_v53 = vpop.permute.xlu0 %524  ;;  %536 = vst.msk [vmem:[#allocation2 + $0xc] sm:$0xf] %vm532_vm4, %v527_v0 }
  0xd7   : > { %535 = vst.msk [vmem:[#allocation2 + $0x8] sm:$0xf] %vm532_vm4, %v525_v53 }
  0xd9   : > { %v604_v45 = vpop.permute.xlu1 %603 }
  0xda   : > { %614 = vst.msk [vmem:[#allocation3 + $0x4] sm:$0xf] %vm319_vm13, %v604_v45  ;;  %v602_v41 = vpop.permute.xlu0 %601 }
  0xdb   : > { %613 = vst.msk [vmem:[#allocation3] sm:$0xf] %vm319_vm13, %v602_v41 }
  0xdd   : > { %v608_v54 = vpop.permute.xlu1 %607 }
  0xde   : > { %616 = vst.msk [vmem:[#allocation3 + $0xc] sm:$0xf] %vm319_vm13, %v608_v54  ;;  %v606_v55 = vpop.permute.xlu0 %605 }
  0xdf   : > { %615 = vst.msk [vmem:[#allocation3 + $0x8] sm:$0xf] %vm319_vm13, %v606_v55 }
  0xe1   : > { %v620_v38 = vpop.permute.xlu1 %619 }
  0xe2   : > { %630 = vst.msk [vmem:[#allocation3 + $0x4] sm:$0xf] %vm336_vm14, %v620_v38  ;;  %v618_v56 = vpop.permute.xlu0 %617 }
  0xe3   : > { %629 = vst.msk [vmem:[#allocation3] sm:$0xf] %vm336_vm14, %v618_v56 }
  0xe5   : > { %v624_v58 = vpop.permute.xlu1 %623 }
  0xe6   : > { %632 = vst.msk [vmem:[#allocation3 + $0xc] sm:$0xf] %vm336_vm14, %v624_v58  ;;  %v622_v33 = vpop.permute.xlu0 %621 }
  0xe7   : > { %631 = vst.msk [vmem:[#allocation3 + $0x8] sm:$0xf] %vm336_vm14, %v622_v33 }
  0xe9   : > { %v708_v59 = vpop.permute.xlu1 %707 }
  0xea   : > { %v706_v60 = vpop.permute.xlu0 %705  ;;  %718 = vst.msk [vmem:[#allocation3 + $0x4] sm:$0xf] %vm428_vm15, %v708_v59 }
  0xeb   : > { %717 = vst.msk [vmem:[#allocation3] sm:$0xf] %vm428_vm15, %v706_v60 }
  0xed   : > { %v712_v61 = vpop.permute.xlu1 %711 }
  0xee   : > { %v710_v62 = vpop.permute.xlu0 %709  ;;  %720 = vst.msk [vmem:[#allocation3 + $0xc] sm:$0xf] %vm428_vm15, %v712_v61 }
  0xef   : > { %719 = vst.msk [vmem:[#allocation3 + $0x8] sm:$0xf] %vm428_vm15, %v710_v62 }
  0xf1   : > { %v724_v63 = vpop.permute.xlu1 %723 }
  0xf2   : > { %v722_v7 = vpop.permute.xlu0 %721  ;;  %734 = vst.msk [vmem:[#allocation3 + $0x4] sm:$0xf] %vm445_vm0, %v724_v63 }
  0xf3   : > { %733 = vst.msk [vmem:[#allocation3] sm:$0xf] %vm445_vm0, %v722_v7 }
  0xf5   : > { %v728_v8 = vpop.permute.xlu1 %727 }
  0xf6   : > { %v726_v10 = vpop.permute.xlu0 %725  ;;  %736 = vst.msk [vmem:[#allocation3 + $0xc] sm:$0xf] %vm445_vm0, %v728_v8 }
  0xf7   : > { %735 = vst.msk [vmem:[#allocation3 + $0x8] sm:$0xf] %vm445_vm0, %v726_v10 }
  0xf9   : > { %v740_v11 = vpop.permute.xlu1 %739 }
  0xfa   : > { %v738_v12 = vpop.permute.xlu0 %737  ;;  %750 = vst.msk [vmem:[#allocation3 + $0x4] sm:$0xf] %vm462_vm1, %v740_v11 }
  0xfb   : > { %749 = vst.msk [vmem:[#allocation3] sm:$0xf] %vm462_vm1, %v738_v12 }
  0xfd   : > { %v744_v13 = vpop.permute.xlu1 %743 }
  0xfe   : > { %v742_v14 = vpop.permute.xlu0 %741  ;;  %752 = vst.msk [vmem:[#allocation3 + $0xc] sm:$0xf] %vm462_vm1, %v744_v13 }
  0xff   : > { %751 = vst.msk [vmem:[#allocation3 + $0x8] sm:$0xf] %vm462_vm1, %v742_v14 }
 0x101   : > { %v772_v15 = vpop.permute.xlu1 %771 }
 0x102   : > { %v770_v4 = vpop.permute.xlu0 %769  ;;  %782 = vst.msk [vmem:[#allocation3 + $0x4] sm:$0xf] %vm498_vm2, %v772_v15 }
 0x103   : > { %781 = vst.msk [vmem:[#allocation3] sm:$0xf] %vm498_vm2, %v770_v4 }
 0x105   : > { %v776_v16 = vpop.permute.xlu1 %775 }
 0x106   : > { %v774_v17 = vpop.permute.xlu0 %773  ;;  %784 = vst.msk [vmem:[#allocation3 + $0xc] sm:$0xf] %vm498_vm2, %v776_v16 }
 0x107   : > { %783 = vst.msk [vmem:[#allocation3 + $0x8] sm:$0xf] %vm498_vm2, %v774_v17 }
 0x109   : > { %v788_v9 = vpop.permute.xlu1 %787 }
 0x10a   : > { %v786_v19 = vpop.permute.xlu0 %785  ;;  %798 = vst.msk [vmem:[#allocation3 + $0x4] sm:$0xf] %vm515_vm3, %v788_v9 }
 0x10b   : > { %797 = vst.msk [vmem:[#allocation3] sm:$0xf] %vm515_vm3, %v786_v19 }
 0x10d   : > { %v792_v20 = vpop.permute.xlu1 %791 }
 0x10e   : > { %v790_v18 = vpop.permute.xlu0 %789  ;;  %800 = vst.msk [vmem:[#allocation3 + $0xc] sm:$0xf] %vm515_vm3, %v792_v20 }
 0x10f   : > { %799 = vst.msk [vmem:[#allocation3 + $0x8] sm:$0xf] %vm515_vm3, %v790_v18 }
 0x111   : > { %v804_v21 = vpop.permute.xlu1 %803 }
 0x112   : > { %v802_v22 = vpop.permute.xlu0 %801  ;;  %814 = vst.msk [vmem:[#allocation3 + $0x4] sm:$0xf] %vm532_vm4, %v804_v21 }
 0x113   : > { %813 = vst.msk [vmem:[#allocation3] sm:$0xf] %vm532_vm4, %v802_v22 }
 0x115   : > { %v808_v24 = vpop.permute.xlu1 %807 }
 0x116   : > { %v806_v26 = vpop.permute.xlu0 %805  ;;  %816 = vst.msk [vmem:[#allocation3 + $0xc] sm:$0xf] %vm532_vm4, %v808_v24 }
 0x117   : > { %815 = vst.msk [vmem:[#allocation3 + $0x8] sm:$0xf] %vm532_vm4, %v806_v26 }
 0x118 PF: > { %v1298_v40 = vld [vmem:[%s2012_s2 + $0x10] ss:$0 sps:$4 sm:$0x33]   ;;  %v1408_v43 = vmov 0.0   ;;  %vm862_vm5 = vcmask 1041408   ;;  %v1300_v46 = vld [vmem:[%s2012_s2 + $0x8] sm:$0xff]  }
 0x119   : > { %1185 = vmatprep.subr.bf16.mxu0 %v1408_v43  ;;  %1195 = vmatprep.subr.bf16.mxu1 %v1408_v43  ;;  %v1299_v23 = vld [vmem:[%s2011_s1 + $0x10] ss:$0 sps:$4 sm:$0x33]   ;;  %v864_v27 = vsel %vm862_vm5, %v1298_v40, 0  ;;  %v1301_v25 = vld [vmem:[%s2011_s1 + $0x8] sm:$0xff]   ;;  %vm1409_vm6 = vmmov 0  }
 0x11a   : > { %1186 = vmatpush3.bf16.msra.mxu0 %v864_v27  ;;  %v923_v44 = vsel %vm862_vm5, %v1299_v23, 0  ;;  %1191 = vmatprep.mubr.msk.bf16.mxu0 %vm1409_vm6, %v1408_v43  ;;  %s1152_s9 = sshll.u32 %s1382_s18, 4  ;;  %v1302_v37 = vld [vmem:[%s2012_s2] sm:$0xff]   ;;  %vm858_vm7 = vcmask 293888   ;;  %s1167_s5 = sshll.u32 %s1382_s18, 1  ;;  %vm1020_vm8 = vcmask 261120  }
 0x11b   : > { %1196 = vmatpush3.bf16.msra.mxu1 %v923_v44  ;;  %1187 = vmatprep.subr.bf16.mxu0 %v1408_v43  ;;  %s818_s10 = sshra.s32 %s1152_s9, 3  ;;  %v1303_v47 = vld [vmem:[%s2011_s1] sm:$0xff]   ;;  %s1168_s6 = sshll.u32 %s1386_s19, 2 }
 0x11c   : > { %1197 = vmatprep.subr.bf16.mxu1 %v1408_v43  ;;  %1201 = vmatprep.mubr.msk.bf16.mxu1 %vm1409_vm6, %v1408_v43  ;;  %s1153_s13 = sshll.u32 %s818_s10, 2  ;;  %v1017_v2 = vld [vmem:[%s2013_s3] sm:$0xff]  ;;  %s1036_s11 = sadd.s32 %s1168_s6, %s1167_s5 }
 0x11d   : > { %s821_s27 = scalar_lea.vmem [#allocation2], %s1153_s13  ;;  %s825_s30 = scalar_lea.vmem [#allocation3], %s1153_s13 }
 0x11e   : > { %1188 = vmatpush3.bf16.msra.mxu0 %v1300_v46  ;;  %v1304_v50 = vld [vmem:[%s821_s27] sm:$0xff]   ;;  %s1169_s12 = sshll.u32 %s1036_s11, 7  ;;  %s1039_s13 = sshll.u32 %s1517_s23, 4  ;;  %s1954_s13 = int_to_ptr.vmem [resolvable:$true] %s1039_s13 }
 0x11f   : > { %1198 = vmatpush3.bf16.msra.mxu1 %v1301_v25  ;;  %1189 = vmatprep.subr.bf16.mxu0 %v1408_v43  ;;  %v1305_v57 = vld [vmem:[%s825_s30] sm:$0xff]   ;;  %s1952_s14 = scalar_lea.hbm %s2014_s4, %s1169_s12  ;;  %s1959_s24 = scalar_lea.sflag [#allocation5], %s202_s8 }
 0x120   : > { %1199 = vmatprep.subr.bf16.mxu1 %v1408_v43  ;;  %s1306_s27 = scalar_lea.vmem %s1954_s13, 256  ;;  %s1410_s30 = smov [#allocation4]  }
 0x121   : > { %p1307_p0 = scmp.ne.s32.totalorder %s1954_s13, %s1306_s27  ;;  %s1310_s5 = sshll.u32 %s1410_s30, 4  ;;  %s1311_s5 = int_to_ptr.vmem [resolvable:$false] %s1310_s5 }
 0x122   : > { %1190 = vmatpush3.bf16.msra.mxu0 %v1302_v37  ;;  %s1312_s6 = scalar_lea.vmem %s1311_s5, 512  ;;  %p1313_p4 = scmp.lt.s32.totalorder %s1954_s13, %s1311_s5 }
 0x123   : > { %1200 = vmatpush3.bf16.msra.mxu1 %v1303_v47  ;;  %1205 = vmatprep.subr.bf16.mxu0 %v1408_v43  ;;  %p1308_p1 = pnand %p1307_p0, %p1489_p3  ;;  %p1314_p5 = scmp.lt.s32.totalorder %s1312_s6, %s1306_s27 }
 0x125   : > { %1192 = vmatmul.mubr.msk.bf16.vlgmr.msra.gmra.mxu0 %vm858_vm7, %v1304_v50  ;;  %p1309_p2 = pneg %p1308_p1  ;;  %p1315_p6 = por %p1314_p5, %p1313_p4 }
 0x126   : > { %1202 = vmatmul.mubr.msk.bf16.vlgmr.msra.gmra.mxu1 %vm858_vm7, %v1304_v50  ;;  %1206 = vmatpush3.bf16.msra.mxu0 %v923_v44 }
 0x127   : > { %1207 = vmatprep.subr.bf16.mxu0 %v1408_v43  ;;  %1211 = vmatprep.mubr.msk.bf16.mxu0 %vm1409_vm6, %v1408_v43  ;;  %p1316_p7 = pnand %p1315_p6, %p1309_p2 }
 0x12a   : > { %1208 = vmatpush3.bf16.msra.mxu0 %v1301_v25 }
 0x12b   : > { %1209 = vmatprep.subr.bf16.mxu0 %v1408_v43 }
 0x12e   : > { %1210 = vmatpush3.bf16.msra.mxu0 %v1303_v47 }
 0x131   : > { %1212 = vmatmul.mubr.msk.bf16.vlgmr.msra.gmra.mxu0 %vm858_vm7, %v1305_v57 }
 0x1e5   : > { %v900_v28 = vpop.f32.mrf.mxu0 }
 0x1e6   : > { %v959_v29 = vpop.f32.mrf.mxu1 }
 0x1e7   : > { %v1193_v30 = vpop.f32.mrf.mxu0  ;;  %v960_v39 = vadd.f32 %v959_v29, %v900_v28 }
 0x1e8   : > { %v1203_v31 = vpop.f32.mrf.mxu1 }
 0x1e9   : > { %v903_v32 = vpop.f32.mrf.mxu0 }
 0x1ea   : > { %v962_v34 = vpop.f32.mrf.mxu1 }
 0x1eb   : > { %v1194_v35 = vpop.f32.mrf.mxu0  ;;  %v963_v6 = vadd.f32 %v962_v34, %v903_v32 }
 0x1ec   : > { %v1204_v36 = vpop.f32.mrf.mxu1 }
 0x1f1   : > { %v1008_v42 = vpop.f32.mrf.mxu0 }
 0x1f2   : > { %v1015_v5 = vadd.f32 %v1008_v42, %v960_v39 }
 0x1f3   : > { %v1213_v1 = vpop.f32.mrf.mxu0 }
 0x1f4   : > { %v1018_v48 = vadd.f32 %v1017_v2, %v1015_v5 }
 0x1f5   : > { %v1011_v49 = vpop.f32.mrf.mxu0 }
 0x1f6   : > { %1021 = vst.msk [vmem:[%s1517_s23] sm:$0xff] %vm1020_vm8, %v1018_v48  ;;  %v1016_v51 = vadd.f32 %v1011_v49, %v963_v6 }
 0x1f7   : > { %v1214_v52 = vpop.f32.mrf.mxu0 }
 0x1f8   : > { %v1019_v3 = vadd.f32 %v1017_v2, %v1016_v51 }
 0x1fa   : > { %1022 = vst.msk [vmem:[%s1517_s23 + $0x8] sm:$0xff] %vm1020_vm8, %v1019_v3 }
 0x1fb   : > { %1319 = shalt.err (!%p1316_p7)
}
 0x1fc   : > { %s1320_s8 = scalar_lea.hbm %s1952_s14, 256  ;;  %s1324_s10 = scalar_lea.hbm %s2014_s4, 1024 }
 0x1fd   : > { %p1321_p9 = scmp.ne.s32.totalorder %s1952_s14, %s1320_s8  ;;  %p1325_p12 = scmp.lt.s32.totalorder %s1952_s14, %s2014_s4 }
 0x1fe   : > { %p1326_p13 = scmp.lt.s32.totalorder %s1324_s10, %s1320_s8 }
 0x1ff   : > { %p1322_p10 = pnand %p1321_p9, %p1489_p3 }
 0x200   : > { %p1327_p0 = por %p1326_p13, %p1325_p12 }
 0x201   : > { %p1323_p11 = pneg %p1322_p10 }
 0x203   : > { %p1328_p1 = pnand %p1327_p0, %p1323_p11 }
 0x205   : > { %1331 = shalt.err (!%p1328_p1)
}
 0x206   : > { %s1411_s18 = smov 128   ;;  %s1412_s19 = smov 8  }
 0x207   : > { %1215 = dma.vmem_to_hbm [thread:$0]  (%p1489_p3), %s1954_s13, 256, %s1952_s14, %s1959_s24, %s1411_s18, %s1411_s18, %s1412_s19  }
 0x208 PF: > { %p1221_p2 = scmp.ge.s32.totalorder %s1398_s22, 2  ;;  %s1054_s27 = sand.u32 1, %s1370_s15  }
 0x209   : > { %s1055_s30 = scalar_lea.sflag [#allocation5], %s1054_s27 }
 0x20a   : > { %p1218_p4 = pnand %p1221_p2, %p1498_p8 }
 0x20c   : > { %p1219_p5 = pneg %p1218_p4 }
 0x20e   : > { %1365 = dma.done.wait (%p1219_p5), %s1055_s30, 256  }
 0x20f   : > { %1367 = vsyncadd (%p1219_p5), %s1055_s30, 4294967040  ;;  %s17_s22 = sadd.s32 1, %s1398_s22   ;;  %s2025_s15 = smov %s1374_s16 }
 0x210   : > { %p14_p6 = scmp.ge.s32.totalorder %s17_s22, 6   ;;  %s2026_s16 = smov %s1378_s17 }
 0x211   : > { %s2027_s17 = smov %s1507_s7  ;;  %s2028_s18 = smov %s1390_s20 }
 0x212   : > { %s2029_s19 = smov %s1394_s21  ;;  %s2030_s20 = smov %s2033_s25 }
 0x213   : > { %s2031_s21 = smov %s2037_s26  ;;  %16 = sbr.rel (!%p14_p6) target bundleno = 5 (0x5), region = 77 }
 0x218   :  { %1060 = vsyncpa [#allocation5], 1 }
 0x219   :  { %1062 = vsyncpa [#allocation5 + $0x1], 1 }

</bundles_post_ra>
